<compile_context>
chip_gen: v6e
topology: v6e:2x2x1
jax: 0.10.0
libtpu: 0.0.40
codegen_flags: <defaults>
</compile_context>

<pallas_src>
import functools

import jax
import jax.numpy as jnp
from jax.experimental import pallas as pl
from jax.experimental.pallas import tpu as pltpu


def _round_up(x, m):
    return (x + m - 1) // m * m


def _device_is_old_gen():
    """True for v5e and older (no bf16 VALU); False for v6e/v7x/unknown-new."""
    try:
        kind = jax.devices()[0].device_kind.lower()
    except Exception:
        return True  # conservative: f32 counts work everywhere
    return any(tag in kind for tag in ("v2", "v3", "v4", "v5"))


def fused_embed_pool_linear_kernel(ids_ref, w_ref, out_ref, *,
                                   bias_row, count_dtype):
    """One batch block of: sigmoid( W_fused^T @ counts^T )  (transposed layout).

    W_fused^T = (W_linear @ emb_table^T) / S with the bias written into the
    spare padded vocab column `bias_row`, so the kernel only builds per-column
    vocab counts and performs a single MXU matmul.
    """
    ids = ids_ref[...]                                   # (S, Bb) int32, lane=batch
    S, Bb = ids.shape
    Vp = w_ref.shape[1]

    # Vocab index along sublanes, batch along lanes.
    iota_v = jax.lax.broadcasted_iota(jnp.int32, (Vp, Bb), 0)

    # Bias fold: seed counts[bias_row, :] = 1 (ids never hit that row since
    # real ids < V <= bias_row).  Two partial accumulators break the serial
    # VALU dependency chain of the S unrolled compare+adds.
    acc0 = (iota_v == bias_row).astype(count_dtype)
    acc1 = jnp.zeros((Vp, Bb), count_dtype)
    for s in range(S):                                   # S is small and static
        hit = (ids[s:s + 1, :] == iota_v).astype(count_dtype)  # sublane bcast
        if s % 2 == 0:
            acc0 = acc0 + hit
        else:
            acc1 = acc1 + hit
    counts = (acc0 + acc1).astype(jnp.bfloat16)          # counts <= S: exact in bf16

    # Single MXU matmul: (Cp, Vp) bf16 @ (Vp, Bb) bf16 -> f32 acc; sigmoid on EUP.
    logits_t = jnp.dot(w_ref[...], counts, preferred_element_type=jnp.float32)
    out_ref[...] = jax.nn.sigmoid(logits_t)              # (Cp, Bb) f32, lane-dense


def torch_model_forward(x_ids, emb_table, w, b, *, batch_block=None):
    """x_ids: (B, S) int; emb_table: (V, D) f32; w: (C, D) f32; b: (C,) f32."""
    B, S = x_ids.shape
    V, _ = emb_table.shape
    C = w.shape[0]

    old_gen = _device_is_old_gen()
    count_dtype = jnp.float32 if old_gen else jnp.bfloat16  # no bf16 VALU on v5e

    if batch_block is None:
        batch_block = 128 if old_gen else 256            # fill the MXU M-dim
        # Don't pad a tiny batch far past one MXU-filling block.
        batch_block = min(batch_block, max(128, _round_up(B, 128)))
        # Prefer >= 2 grid steps when the batch allows it (v7x has 2 TCs).
        if B > 128 and _round_up(B, batch_block) // batch_block < 2:
            batch_block = 128
    Bp = _round_up(B, batch_block)

    # Pad to vreg/MXU-friendly shapes.  V+1 reserves a spare vocab slot for
    # the folded bias; both Vp and Cp are lane multiples of 128.
    Vp = _round_up(V + 1, 128)
    Cp = _round_up(C, 128)

    # Fold Embedding + AvgPool1d(S) + Linear (+ bias) into one (Cp, Vp) weight.
    # padding_idx=0 is handled by the zero row of emb_table (column 0 of the
    # fused weight is zero).  Runs once in XLA at highest precision.
    w_fused_t = jnp.dot(w, emb_table.T,
                        precision=jax.lax.Precision.HIGHEST) * (1.0 / S)  # (C, V)
    w_t_pad = (jnp.zeros((Cp, Vp), jnp.float32)
               .at[:C, :V].set(w_fused_t)
               .at[:C, V].set(b)                 # bias folded into spare column V
               .astype(jnp.bfloat16))            # bf16 MXU operand

    # Lane-dense ids layout: (S, Bp) with batch on the lane axis.
    ids_t = jnp.zeros((S, Bp), jnp.int32).at[:, :B].set(x_ids.astype(jnp.int32).T)

    kernel = functools.partial(fused_embed_pool_linear_kernel,
                               bias_row=V, count_dtype=count_dtype)

    # TODO(synk): for a realistic large vocab, keep the fused weight in HBM
    # (memory_space=pl.ANY), tile Vp as a trailing "arbitrary" reduction axis
    # with an f32 VMEM accumulator, and set vmem_limit_bytes explicitly so the
    # same kernel fits v7x's 64 MiB VMEM.

    out_t = pl.pallas_call(
        kernel,
        out_shape=jax.ShapeDtypeStruct((Cp, Bp), jnp.float32),
        grid_spec=pltpu.PrefetchScalarGridSpec(
            num_scalar_prefetch=0,
            grid=(Bp // batch_block,),
            in_specs=[
                pl.BlockSpec((S, batch_block), lambda i: (0, i)),   # ids tile
                pl.BlockSpec((Cp, Vp), lambda i: (0, 0)),           # fused W (resident)
            ],
            out_specs=pl.BlockSpec((Cp, batch_block), lambda i: (0, i)),
        ),
        compiler_params=pltpu.CompilerParams(
            dimension_semantics=("parallel",),
        ),
    )(ids_t, w_t_pad)

    # Padded batch columns / class rows are garbage; slice them off, then
    # transpose back to (B, C).
    return out_t[:C, :B].T


def reference_forward(x_ids, emb_table, w, b):
    """Pure-JAX reference mirroring the PyTorch forward exactly (f32)."""
    e = jnp.take(emb_table, x_ids, axis=0)       # (B, S, D)  embedding
    pooled = jnp.mean(e, axis=1)                 # (B, D)     avgpool over seq + squeeze
    logits = pooled @ w.T + b                    # (B, C)     Linear
    return jax.nn.sigmoid(logits)


if __name__ == "__main__":
    # Small shapes consistent with the module:
    VOCAB = 30            # len(vocab)
    CHAR_DIM = 32         # char_dim
    SENT_LEN = 8          # sentence_max_len
    OUT = SENT_LEN + 1    # classify output size
    B = 4                 # batch

    key = jax.random.PRNGKey(0)
    k_ids, k_emb, k_w, k_b = jax.random.split(key, 4)

    # Deterministic parameter init (synthetic, not a checkpoint load).
    emb_table = jax.random.normal(k_emb, (VOCAB, CHAR_DIM), jnp.float32) * 0.1
    emb_table = emb_table.at[0].set(0.0)   # padding_idx=0 -> row 0 is zeros
    w = jax.random.normal(k_w, (OUT, CHAR_DIM), jnp.float32) * 0.1
    b = jax.random.normal(k_b, (OUT,), jnp.float32) * 0.1

    x_ids = jax.random.randint(k_ids, (B, SENT_LEN), 0, VOCAB, dtype=jnp.int32)

    out = torch_model_forward(x_ids, emb_table, w, b)
    out = jax.block_until_ready(out)

    ref = reference_forward(x_ids, emb_table, w, b)
    assert out.shape == (B, OUT)
    # bf16 fused weight (incl. folded bias) -> allow ~1e-3 absolute slack.
    assert jnp.allclose(out, ref, atol=2e-3, rtol=0), "mismatch vs reference"

    # TODO(synk): training-path cross_entropy loss (y is not None) is not part
    # of the inference kernel; only the forward/inference path is implemented.
    print("KERNEL_OK")
</pallas_src>

<mosaic_0001>
module attributes {stable_mosaic.version = 11 : i64} {
  func.func @fused_embed_pool_linear_kernel(%arg0: i32, %arg1: memref<8x128xi32, #tpu.memory_space<vmem>>, %arg2: memref<128x128xbf16, #tpu.memory_space<vmem>>, %arg3: memref<128x128xf32, #tpu.memory_space<vmem>>) attributes {dimension_semantics = [#tpu.dimension_semantics<parallel>], iteration_bounds = array<i64: 1>, scalar_prefetch = 0 : i64, scratch_operands = 0 : i64, tpu.core_type = #tpu.core_type<tc>, window_params = [{transform_indices = @transform_0, window_bounds = array<i64: 8, 128>}, {pipeline_mode = #tpu.pipeline_mode<synchronous>, transform_indices = @transform_1, window_bounds = array<i64: 128, 128>}, {transform_indices = @transform_2, window_bounds = array<i64: 128, 128>}]} {
    %c0 = arith.constant 0 : index
    %c0_0 = arith.constant 0 : index
    %0 = vector.load %arg1[%c0, %c0_0] : memref<8x128xi32, #tpu.memory_space<vmem>>, vector<8x128xi32>
    %1 = tpu.iota {dimensions = array<i32: 0>} : vector<128x128xi32>
    %c30_i32 = arith.constant 30 : i32
    %2 = vector.broadcast %c30_i32 : i32 to vector<128x128xi32>
    %3 = arith.cmpi eq, %1, %2 : vector<128x128xi32>
    %4 = arith.extui %3 : vector<128x128xi1> to vector<128x128xi32>
    %5 = arith.sitofp %4 : vector<128x128xi32> to vector<128x128xf32>
    %6 = arith.truncf %5 : vector<128x128xf32> to vector<128x128xbf16>
    %cst = arith.constant 0.000000e+00 : bf16
    %7 = vector.broadcast %cst : bf16 to vector<128x128xbf16>
    %8 = vector.extract_strided_slice %0 {offsets = [0, 0], sizes = [1, 128], strides = [1, 1]} : vector<8x128xi32> to vector<1x128xi32>
    %9 = vector.broadcast %8 : vector<1x128xi32> to vector<128x128xi32>
    %10 = arith.cmpi eq, %9, %1 : vector<128x128xi32>
    %11 = arith.extui %10 : vector<128x128xi1> to vector<128x128xi32>
    %12 = arith.sitofp %11 : vector<128x128xi32> to vector<128x128xf32>
    %13 = arith.truncf %12 : vector<128x128xf32> to vector<128x128xbf16>
    %14 = arith.addf %6, %13 : vector<128x128xbf16>
    %15 = vector.extract_strided_slice %0 {offsets = [1, 0], sizes = [1, 128], strides = [1, 1]} : vector<8x128xi32> to vector<1x128xi32>
    %16 = vector.broadcast %15 : vector<1x128xi32> to vector<128x128xi32>
    %17 = arith.cmpi eq, %16, %1 : vector<128x128xi32>
    %18 = arith.extui %17 : vector<128x128xi1> to vector<128x128xi32>
    %19 = arith.sitofp %18 : vector<128x128xi32> to vector<128x128xf32>
    %20 = arith.truncf %19 : vector<128x128xf32> to vector<128x128xbf16>
    %21 = arith.addf %7, %20 : vector<128x128xbf16>
    %22 = vector.extract_strided_slice %0 {offsets = [2, 0], sizes = [1, 128], strides = [1, 1]} : vector<8x128xi32> to vector<1x128xi32>
    %23 = vector.broadcast %22 : vector<1x128xi32> to vector<128x128xi32>
    %24 = arith.cmpi eq, %23, %1 : vector<128x128xi32>
    %25 = arith.extui %24 : vector<128x128xi1> to vector<128x128xi32>
    %26 = arith.sitofp %25 : vector<128x128xi32> to vector<128x128xf32>
    %27 = arith.truncf %26 : vector<128x128xf32> to vector<128x128xbf16>
    %28 = arith.addf %14, %27 : vector<128x128xbf16>
    %29 = vector.extract_strided_slice %0 {offsets = [3, 0], sizes = [1, 128], strides = [1, 1]} : vector<8x128xi32> to vector<1x128xi32>
    %30 = vector.broadcast %29 : vector<1x128xi32> to vector<128x128xi32>
    %31 = arith.cmpi eq, %30, %1 : vector<128x128xi32>
    %32 = arith.extui %31 : vector<128x128xi1> to vector<128x128xi32>
    %33 = arith.sitofp %32 : vector<128x128xi32> to vector<128x128xf32>
    %34 = arith.truncf %33 : vector<128x128xf32> to vector<128x128xbf16>
    %35 = arith.addf %21, %34 : vector<128x128xbf16>
    %36 = vector.extract_strided_slice %0 {offsets = [4, 0], sizes = [1, 128], strides = [1, 1]} : vector<8x128xi32> to vector<1x128xi32>
    %37 = vector.broadcast %36 : vector<1x128xi32> to vector<128x128xi32>
    %38 = arith.cmpi eq, %37, %1 : vector<128x128xi32>
    %39 = arith.extui %38 : vector<128x128xi1> to vector<128x128xi32>
    %40 = arith.sitofp %39 : vector<128x128xi32> to vector<128x128xf32>
    %41 = arith.truncf %40 : vector<128x128xf32> to vector<128x128xbf16>
    %42 = arith.addf %28, %41 : vector<128x128xbf16>
    %43 = vector.extract_strided_slice %0 {offsets = [5, 0], sizes = [1, 128], strides = [1, 1]} : vector<8x128xi32> to vector<1x128xi32>
    %44 = vector.broadcast %43 : vector<1x128xi32> to vector<128x128xi32>
    %45 = arith.cmpi eq, %44, %1 : vector<128x128xi32>
    %46 = arith.extui %45 : vector<128x128xi1> to vector<128x128xi32>
    %47 = arith.sitofp %46 : vector<128x128xi32> to vector<128x128xf32>
    %48 = arith.truncf %47 : vector<128x128xf32> to vector<128x128xbf16>
    %49 = arith.addf %35, %48 : vector<128x128xbf16>
    %50 = vector.extract_strided_slice %0 {offsets = [6, 0], sizes = [1, 128], strides = [1, 1]} : vector<8x128xi32> to vector<1x128xi32>
    %51 = vector.broadcast %50 : vector<1x128xi32> to vector<128x128xi32>
    %52 = arith.cmpi eq, %51, %1 : vector<128x128xi32>
    %53 = arith.extui %52 : vector<128x128xi1> to vector<128x128xi32>
    %54 = arith.sitofp %53 : vector<128x128xi32> to vector<128x128xf32>
    %55 = arith.truncf %54 : vector<128x128xf32> to vector<128x128xbf16>
    %56 = arith.addf %42, %55 : vector<128x128xbf16>
    %57 = vector.extract_strided_slice %0 {offsets = [7, 0], sizes = [1, 128], strides = [1, 1]} : vector<8x128xi32> to vector<1x128xi32>
    %58 = vector.broadcast %57 : vector<1x128xi32> to vector<128x128xi32>
    %59 = arith.cmpi eq, %58, %1 : vector<128x128xi32>
    %60 = arith.extui %59 : vector<128x128xi1> to vector<128x128xi32>
    %61 = arith.sitofp %60 : vector<128x128xi32> to vector<128x128xf32>
    %62 = arith.truncf %61 : vector<128x128xf32> to vector<128x128xbf16>
    %63 = arith.addf %49, %62 : vector<128x128xbf16>
    %64 = arith.addf %56, %63 : vector<128x128xbf16>
    %c0_1 = arith.constant 0 : index
    %c0_2 = arith.constant 0 : index
    %65 = vector.load %arg2[%c0_1, %c0_2] : memref<128x128xbf16, #tpu.memory_space<vmem>>, vector<128x128xbf16>
    %cst_3 = arith.constant dense<0.000000e+00> : vector<128x128xf32>
    %66 = tpu.matmul %65, %64, %cst_3 {dimension_numbers = #tpu.dot_dimension_numbers<[1], [0], [0], [1], [0, 0, 1, 1], [], []>} : vector<128x128xbf16>, vector<128x128xbf16>, vector<128x128xf32> -> vector<128x128xf32>
    %67 = arith.negf %66 : vector<128x128xf32>
    %68 = math.exp %67 : vector<128x128xf32>
    %cst_4 = arith.constant 1.000000e+00 : f32
    %69 = vector.broadcast %cst_4 : f32 to vector<128x128xf32>
    %70 = arith.addf %69, %68 : vector<128x128xf32>
    %71 = arith.divf %69, %70 : vector<128x128xf32>
    %c0_5 = arith.constant 0 : index
    %c0_6 = arith.constant 0 : index
    %72 = vector.load %arg3[%c0_5, %c0_6] : memref<128x128xf32, #tpu.memory_space<vmem>>, vector<128x128xf32>
    tpu.vector_store %arg3[%c0_5, %c0_6], %71 {strides = array<i32>} : memref<128x128xf32, #tpu.memory_space<vmem>>, vector<128x128xf32>,
    return
  }
  func.func @transform_0(%arg0: i32) -> (i32, i32) {
    %c0_i32 = arith.constant 0 : i32
    %c0_i32_0 = arith.constant 0 : i32
    return %c0_i32, %arg0 : i32, i32
  }
  func.func @transform_1(%arg0: i32) -> (i32, i32) {
    %c0_i32 = arith.constant 0 : i32
    %c0_i32_0 = arith.constant 0 : i32
    %c0_i32_1 = arith.constant 0 : i32
    return %c0_i32, %c0_i32_0 : i32, i32
  }
  func.func @transform_2(%arg0: i32) -> (i32, i32) {
    %c0_i32 = arith.constant 0 : i32
    %c0_i32_0 = arith.constant 0 : i32
    return %c0_i32, %arg0 : i32, i32
  }
}

</mosaic_0001>

<bundles_post_ra>
// kernel: tpu_custom_call.1
= control target key start
LH: loop header
LB: loop body
LE: loop exit
PB: predicated region body
PF: predicated region fallthrough
CT: control target
= control target key end

     0   :  { %7 = vsyncpa [#allocation3], 0  ;;  %s1788_s0 = inlined_call_operand.hbm [shape: s32[8,128], index: 0, kind: input, shape index: {}]   ;;  %s1789_s1 = inlined_call_operand.hbm [shape: bf16[128,128], index: 1, kind: input, shape index: {}]   ;;  %s1790_s2 = inlined_call_operand.hbm [shape: f32[128,128], index: 2, kind: output, shape index: {}]  }
   0x1   :  { %8 = vsyncpa [#allocation6], 0 }
   0x2   :  { %9 = vsyncpa [#allocation4], 0  ;;  %s1319_s9 = smov [#allocation2]   ;;  %s1320_s11 = smov [#allocation5]  }
   0x3   :  { %s16_s10 = sshll.u32 %s1319_s9, 4  ;;  %s25_s12 = sshll.u32 %s1320_s11, 4  ;;  %s17_s10 = int_to_ptr.vmem [resolvable:$true] %s16_s10  ;;  %s26_s12 = int_to_ptr.vmem [resolvable:$true] %s25_s12 }
   0x4   :  { %s1261_s13 = scalar_lea.vmem %s17_s10, 128  ;;  %p1266_p1 = scmp.lt.s32.totalorder %s17_s10, %s17_s10 }
   0x5   :  { %p1262_p0 = scmp.ne.s32.totalorder %s17_s10, %s1261_s13  ;;  %p1267_p2 = scmp.lt.s32.totalorder %s1261_s13, %s1261_s13 }
   0x7   :  { %p1268_p3 = por %p1267_p2, %p1266_p1 }
   0x9   :  { %p1269_p4 = pnand %p1268_p3, %p1262_p0 }
   0xb   :  { %1272 = shalt.err (!%p1269_p4)
}
   0xc   :  { %19 = dma.hbm_to_vmem [thread:$0]  %s1788_s0, 128, %s17_s10, [#allocation3]  }
   0xd   :  { %s1281_s16 = scalar_lea.vmem %s26_s12, 1024  ;;  %p1286_p6 = scmp.lt.s32.totalorder %s26_s12, %s26_s12 }
   0xe   :  { %p1282_p5 = scmp.ne.s32.totalorder %s26_s12, %s1281_s16  ;;  %p1287_p7 = scmp.lt.s32.totalorder %s1281_s16, %s1281_s16 }
  0x10   :  { %p1288_p8 = por %p1287_p7, %p1286_p6 }
  0x12   :  { %p1289_p9 = pnand %p1288_p8, %p1282_p5 }
  0x14   :  { %1292 = shalt.err (!%p1289_p9)
}
  0x15   :  { %s1321_s17 = smov 64   ;;  %s1322_s18 = smov 4  }
  0x16   :  { %31 = dma.hbm_to_vmem [thread:$0]  %s1789_s1, 1024, %s26_s12, [#allocation6], %s1321_s17, %s1321_s17, %s1322_s18  }
  0x17   :  { %1313 = dma.done.wait [#allocation3], 128  }
  0x18   :  { %1314 = vsyncadd [#allocation3], 4294967168 }
  0x19   :  { %1315 = dma.done.wait [#allocation6], 1024  }
  0x1a   :  { %1316 = vsyncadd [#allocation6], 4294966272  ;;  %v40_v0 = vlaneseq  ;;  %v39_v14 = vld [vmem:[#allocation2] sm:$0xff]  ;;  %v1181_v19 = vld [vmem:[#allocation5] sm:$0xff]   ;;  %v1323_v29 = vmov 0.0   ;;  %s1324_s0 = smov [#allocation7]  }
  0x1b   :  { %1141 = vmatprep.mubr.bf16.mxu0 %v1181_v19  ;;  %v1182_v28 = vld [vmem:[#allocation5 + $0x20] sm:$0xff]   ;;  %s943_s1 = sshll.u32 %s1324_s0, 4  ;;  %s944_s1 = int_to_ptr.vmem [resolvable:$true] %s943_s1 }
  0x1c   :  { %v1348_v1 = vshrl.u32 %v40_v0, 7  ;;  %1149 = vmatprep.mubr.bf16.mxu1 %v1182_v28  ;;  %s1293_s21 = scalar_lea.vmem %s944_s1, 2048  ;;  %p1298_p11 = scmp.lt.s32.totalorder %s944_s1, %s944_s1 }
  0x1d   :  { %p1294_p10 = scmp.ne.s32.totalorder %s944_s1, %s1293_s21  ;;  %p1299_p12 = scmp.lt.s32.totalorder %s1293_s21, %s1293_s21 }
  0x1e   :  { %v1351_v2 = vadd.s32 112, %v1348_v1  ;;  %v1354_v3 = vadd.s32 120, %v1348_v1  ;;  %v115_v4 = vsub.s32 0, %v1348_v1  ;;  %v183_v5 = vsub.s32 1, %v1348_v1 }
  0x1f   :  { %v251_v6 = vsub.s32 2, %v1348_v1  ;;  %v319_v7 = vsub.s32 3, %v1348_v1  ;;  %v387_v8 = vsub.s32 4, %v1348_v1  ;;  %v455_v9 = vsub.s32 5, %v1348_v1  ;;  %p1300_p13 = por %p1299_p12, %p1298_p11 }
  0x20   :  { %v523_v10 = vsub.s32 6, %v1348_v1  ;;  %v591_v11 = vsub.s32 7, %v1348_v1  ;;  %v1365_v12 = vadd.s32 96, %v1348_v1  ;;  %v1368_v13 = vadd.s32 104, %v1348_v1 }
  0x21   :  { %v1371_v15 = vadd.s32 80, %v1348_v1  ;;  %v1374_v16 = vadd.s32 88, %v1348_v1  ;;  %v1377_v17 = vadd.s32 64, %v1348_v1  ;;  %v1380_v18 = vadd.s32 72, %v1348_v1  ;;  %p1301_p0 = pnand %p1300_p13, %p1294_p10 }
  0x22   :  { %v1382_v20 = vrot.slane %v39_v14, %v115_v4  ;;  %v1384_v21 = vrot.slane %v39_v14, %v183_v5  ;;  %v1386_v22 = vrot.slane %v39_v14, %v251_v6  ;;  %v1388_v23 = vrot.slane %v39_v14, %v319_v7 }
  0x23   :  { %v1390_v24 = vrot.slane %v39_v14, %v387_v8  ;;  %v1392_v25 = vrot.slane %v39_v14, %v455_v9  ;;  %v1394_v26 = vrot.slane %v39_v14, %v523_v10  ;;  %v1396_v27 = vrot.slane %v39_v14, %v591_v11 }
  0x24   :  { %vm131_vm0 = vcmp.eq.s32.totalorder %v1382_v20, %v1351_v2  ;;  %vm132_vm1 = vcmp.eq.s32.totalorder %v1382_v20, %v1354_v3  ;;  %vm199_vm2 = vcmp.eq.s32.totalorder %v1384_v21, %v1351_v2  ;;  %vm200_vm3 = vcmp.eq.s32.totalorder %v1384_v21, %v1354_v3 }
  0x25   :  { %v971_v30 = vsel %vm131_vm0, 1.0, %v1323_v29  ;;  %v972_v31 = vsel %vm132_vm1, 1.0, %v1323_v29  ;;  %v987_v32 = vsel %vm199_vm2, 1.0, %v1323_v29  ;;  %v988_v33 = vsel %vm200_vm3, 1.0, %v1323_v29 }
  0x26   :  { %v172_v34 = vpack.c.bf16 %v972_v31, %v971_v30  ;;  %v240_v35 = vpack.c.bf16 %v988_v33, %v987_v32  ;;  %vm267_vm4 = vcmp.eq.s32.totalorder %v1386_v22, %v1351_v2  ;;  %vm268_vm5 = vcmp.eq.s32.totalorder %v1386_v22, %v1354_v3 }
  0x27   :  { %v1003_v36 = vsel %vm267_vm4, 1.0, %v1323_v29  ;;  %v1004_v37 = vsel %vm268_vm5, 1.0, %v1323_v29  ;;  %vm335_vm6 = vcmp.eq.s32.totalorder %v1388_v23, %v1351_v2  ;;  %vm336_vm7 = vcmp.eq.s32.totalorder %v1388_v23, %v1354_v3 }
  0x28   :  { %v180_v38 = vadd.bf16 0.0|0.0, %v172_v34  ;;  %v248_v39 = vadd.bf16 0, %v240_v35  ;;  %v308_v40 = vpack.c.bf16 %v1004_v37, %v1003_v36  ;;  %v1019_v41 = vsel %vm335_vm6, 1.0, %v1323_v29 }
  0x29   :  { %v1020_v42 = vsel %vm336_vm7, 1.0, %v1323_v29  ;;  %vm403_vm8 = vcmp.eq.s32.totalorder %v1390_v24, %v1351_v2  ;;  %vm404_vm9 = vcmp.eq.s32.totalorder %v1390_v24, %v1354_v3  ;;  %vm471_vm10 = vcmp.eq.s32.totalorder %v1392_v25, %v1351_v2 }
  0x2a   :  { %v316_v43 = vadd.bf16 %v308_v40, %v180_v38  ;;  %v376_v44 = vpack.c.bf16 %v1020_v42, %v1019_v41  ;;  %v1035_v45 = vsel %vm403_vm8, 1.0, %v1323_v29  ;;  %v1036_v46 = vsel %vm404_vm9, 1.0, %v1323_v29 }
  0x2b   :  { %v444_v47 = vpack.c.bf16 %v1036_v46, %v1035_v45  ;;  %vm472_vm11 = vcmp.eq.s32.totalorder %v1392_v25, %v1354_v3  ;;  %v1051_v48 = vsel %vm471_vm10, 1.0, %v1323_v29  ;;  %vm539_vm12 = vcmp.eq.s32.totalorder %v1394_v26, %v1351_v2 }
  0x2c   :  { %v384_v49 = vadd.bf16 %v376_v44, %v248_v39  ;;  %v1052_v50 = vsel %vm472_vm11, 1.0, %v1323_v29  ;;  %vm540_vm13 = vcmp.eq.s32.totalorder %v1394_v26, %v1354_v3  ;;  %v1067_v51 = vsel %vm539_vm12, 1.0, %v1323_v29 }
  0x2d   :  { %v452_v52 = vadd.bf16 %v444_v47, %v316_v43  ;;  %v512_v53 = vpack.c.bf16 %v1052_v50, %v1051_v48  ;;  %v1068_v54 = vsel %vm540_vm13, 1.0, %v1323_v29  ;;  %vm607_vm14 = vcmp.eq.s32.totalorder %v1396_v27, %v1351_v2 }
  0x2e   :  { %v580_v55 = vpack.c.bf16 %v1068_v54, %v1067_v51  ;;  %vm608_vm15 = vcmp.eq.s32.totalorder %v1396_v27, %v1354_v3  ;;  %v1083_v56 = vsel %vm607_vm14, 1.0, %v1323_v29  ;;  %vm129_vm0 = vcmp.eq.s32.totalorder %v1382_v20, %v1365_v12 }
  0x2f   :  { %v520_v57 = vadd.bf16 %v512_v53, %v384_v49  ;;  %v1084_v58 = vsel %vm608_vm15, 1.0, %v1323_v29  ;;  %vm130_vm1 = vcmp.eq.s32.totalorder %v1382_v20, %v1368_v13  ;;  %v969_v59 = vsel %vm129_vm0, 1.0, %v1323_v29 }
  0x30   :  { %v588_v60 = vadd.bf16 %v580_v55, %v452_v52  ;;  %v648_v61 = vpack.c.bf16 %v1084_v58, %v1083_v56  ;;  %v970_v62 = vsel %vm130_vm1, 1.0, %v1323_v29  ;;  %vm197_vm2 = vcmp.eq.s32.totalorder %v1384_v21, %v1365_v12 }
  0x31   :  { %v171_v63 = vpack.c.bf16 %v970_v62, %v969_v59  ;;  %vm198_vm3 = vcmp.eq.s32.totalorder %v1384_v21, %v1368_v13  ;;  %v985_v0 = vsel %vm197_vm2, 1.0, %v1323_v29  ;;  %vm265_vm4 = vcmp.eq.s32.totalorder %v1386_v22, %v1365_v12 }
  0x32   :  { %v656_v2 = vadd.bf16 %v648_v61, %v520_v57  ;;  %v986_v3 = vsel %vm198_vm3, 1.0, %v1323_v29  ;;  %vm266_vm5 = vcmp.eq.s32.totalorder %v1386_v22, %v1368_v13  ;;  %v1001_v4 = vsel %vm265_vm4, 1.0, %v1323_v29 }
  0x33   :  { %v179_v5 = vadd.bf16 0.0|0.0, %v171_v63  ;;  %v239_v6 = vpack.c.bf16 %v986_v3, %v985_v0  ;;  %v1002_v7 = vsel %vm266_vm5, 1.0, %v1323_v29  ;;  %vm333_vm6 = vcmp.eq.s32.totalorder %v1388_v23, %v1365_v12 }
  0x34   :  { %v664_v8 = vadd.bf16 %v656_v2, %v588_v60  ;;  %v307_v9 = vpack.c.bf16 %v1002_v7, %v1001_v4  ;;  %vm334_vm7 = vcmp.eq.s32.totalorder %v1388_v23, %v1368_v13  ;;  %v1017_v10 = vsel %vm333_vm6, 1.0, %v1323_v29 }
  0x35   :  { %v247_v11 = vadd.bf16 0, %v239_v6  ;;  %v1018_v14 = vsel %vm334_vm7, 1.0, %v1323_v29  ;;  %vm401_vm8 = vcmp.eq.s32.totalorder %v1390_v24, %v1365_v12  ;;  %vm402_vm9 = vcmp.eq.s32.totalorder %v1390_v24, %v1368_v13 }
  0x36   :  { %1125 = vmatprep.subr.bf16.mxu0 %v664_v8  ;;  %1157 = vmatprep.subr.bf16.mxu1 %v664_v8  ;;  %v315_v19 = vadd.bf16 %v307_v9, %v179_v5  ;;  %v375_v28 = vpack.c.bf16 %v1018_v14, %v1017_v10  ;;  %v1033_v30 = vsel %vm401_vm8, 1.0, %v1323_v29  ;;  %v1034_v31 = vsel %vm402_vm9, 1.0, %v1323_v29 }
  0x37   :  { %1126 = vmatpush3.bf16.msra.mxu0 %v664_v8  ;;  %1165 = vmatpush3.bf16.msra.mxu1 %v664_v8  ;;  %v443_v32 = vpack.c.bf16 %v1034_v31, %v1033_v30  ;;  %vm469_vm10 = vcmp.eq.s32.totalorder %v1392_v25, %v1365_v12  ;;  %vm470_vm11 = vcmp.eq.s32.totalorder %v1392_v25, %v1368_v13  ;;  %v1481_v33 = vadd.s32 48, %v1348_v1 }
  0x38   :  { %v383_v34 = vadd.bf16 %v375_v28, %v247_v11  ;;  %v1049_v35 = vsel %vm469_vm10, 1.0, %v1323_v29  ;;  %v1050_v36 = vsel %vm470_vm11, 1.0, %v1323_v29  ;;  %vm537_vm12 = vcmp.eq.s32.totalorder %v1394_v26, %v1365_v12 }
  0x39   :  { %v451_v37 = vadd.bf16 %v443_v32, %v315_v19  ;;  %v511_v38 = vpack.c.bf16 %v1050_v36, %v1049_v35  ;;  %vm538_vm13 = vcmp.eq.s32.totalorder %v1394_v26, %v1368_v13  ;;  %v1065_v39 = vsel %vm537_vm12, 1.0, %v1323_v29 }
  0x3a   :  { %v1066_v40 = vsel %vm538_vm13, 1.0, %v1323_v29  ;;  %vm605_vm14 = vcmp.eq.s32.totalorder %v1396_v27, %v1365_v12  ;;  %vm606_vm15 = vcmp.eq.s32.totalorder %v1396_v27, %v1368_v13  ;;  %vm127_vm0 = vcmp.eq.s32.totalorder %v1382_v20, %v1371_v15 }
  0x3b   :  { %v519_v41 = vadd.bf16 %v511_v38, %v383_v34  ;;  %v579_v42 = vpack.c.bf16 %v1066_v40, %v1065_v39  ;;  %v1081_v43 = vsel %vm605_vm14, 1.0, %v1323_v29  ;;  %v1082_v44 = vsel %vm606_vm15, 1.0, %v1323_v29 }
  0x3c   :  { %v647_v45 = vpack.c.bf16 %v1082_v44, %v1081_v43  ;;  %vm128_vm1 = vcmp.eq.s32.totalorder %v1382_v20, %v1374_v16  ;;  %v967_v46 = vsel %vm127_vm0, 1.0, %v1323_v29  ;;  %vm195_vm2 = vcmp.eq.s32.totalorder %v1384_v21, %v1371_v15 }
  0x3d   :  { %v587_v12 = vadd.bf16 %v579_v42, %v451_v37  ;;  %v968_v13 = vsel %vm128_vm1, 1.0, %v1323_v29  ;;  %vm196_vm3 = vcmp.eq.s32.totalorder %v1384_v21, %v1374_v16  ;;  %v983_v47 = vsel %vm195_vm2, 1.0, %v1323_v29 }
  0x3e   :  { %v655_v48 = vadd.bf16 %v647_v45, %v519_v41  ;;  %v170_v49 = vpack.c.bf16 %v968_v13, %v967_v46  ;;  %v984_v50 = vsel %vm196_vm3, 1.0, %v1323_v29  ;;  %vm263_vm4 = vcmp.eq.s32.totalorder %v1386_v22, %v1371_v15 }
  0x3f   :  { %v238_v51 = vpack.c.bf16 %v984_v50, %v983_v47  ;;  %vm264_vm5 = vcmp.eq.s32.totalorder %v1386_v22, %v1374_v16  ;;  %v999_v52 = vsel %vm263_vm4, 1.0, %v1323_v29  ;;  %vm331_vm6 = vcmp.eq.s32.totalorder %v1388_v23, %v1371_v15 }
  0x40   :  { %v663_v53 = vadd.bf16 %v655_v48, %v587_v12  ;;  %v178_v54 = vadd.bf16 0.0|0.0, %v170_v49  ;;  %v1000_v55 = vsel %vm264_vm5, 1.0, %v1323_v29  ;;  %vm332_vm7 = vcmp.eq.s32.totalorder %v1388_v23, %v1374_v16 }
  0x41   :  { %v246_v56 = vadd.bf16 0, %v238_v51  ;;  %v306_v57 = vpack.c.bf16 %v1000_v55, %v999_v52  ;;  %v1015_v58 = vsel %vm331_vm6, 1.0, %v1323_v29  ;;  %v1016_v59 = vsel %vm332_vm7, 1.0, %v1323_v29 }
  0x42   :  { %1127 = vmatprep.subr.bf16.mxu0 %v663_v53  ;;  %1158 = vmatprep.subr.bf16.mxu1 %v663_v53  ;;  %v374_v60 = vpack.c.bf16 %v1016_v59, %v1015_v58  ;;  %vm399_vm8 = vcmp.eq.s32.totalorder %v1390_v24, %v1371_v15  ;;  %vm400_vm9 = vcmp.eq.s32.totalorder %v1390_v24, %v1374_v16  ;;  %v1526_v61 = vadd.s32 56, %v1348_v1 }
  0x43   :  { %1128 = vmatpush3.bf16.msra.mxu0 %v663_v53  ;;  %1166 = vmatpush3.bf16.msra.mxu1 %v663_v53  ;;  %v314_v62 = vadd.bf16 %v306_v57, %v178_v54  ;;  %v1031_v63 = vsel %vm399_vm8, 1.0, %v1323_v29  ;;  %v1032_v0 = vsel %vm400_vm9, 1.0, %v1323_v29  ;;  %vm467_vm10 = vcmp.eq.s32.totalorder %v1392_v25, %v1371_v15 }
  0x44   :  { %v382_v2 = vadd.bf16 %v374_v60, %v246_v56  ;;  %v442_v3 = vpack.c.bf16 %v1032_v0, %v1031_v63  ;;  %vm468_vm11 = vcmp.eq.s32.totalorder %v1392_v25, %v1374_v16  ;;  %v1047_v4 = vsel %vm467_vm10, 1.0, %v1323_v29 }
  0x45   :  { %v1048_v5 = vsel %vm468_vm11, 1.0, %v1323_v29  ;;  %vm535_vm12 = vcmp.eq.s32.totalorder %v1394_v26, %v1371_v15  ;;  %vm536_vm13 = vcmp.eq.s32.totalorder %v1394_v26, %v1374_v16  ;;  %vm603_vm14 = vcmp.eq.s32.totalorder %v1396_v27, %v1371_v15 }
  0x46   :  { %v450_v6 = vadd.bf16 %v442_v3, %v314_v62  ;;  %v510_v7 = vpack.c.bf16 %v1048_v5, %v1047_v4  ;;  %v1063_v8 = vsel %vm535_vm12, 1.0, %v1323_v29  ;;  %v1064_v9 = vsel %vm536_vm13, 1.0, %v1323_v29 }
  0x47   :  { %v578_v10 = vpack.c.bf16 %v1064_v9, %v1063_v8  ;;  %vm604_vm15 = vcmp.eq.s32.totalorder %v1396_v27, %v1374_v16  ;;  %v1079_v11 = vsel %vm603_vm14, 1.0, %v1323_v29  ;;  %vm125_vm0 = vcmp.eq.s32.totalorder %v1382_v20, %v1377_v17 }
  0x48   :  { %v518_v14 = vadd.bf16 %v510_v7, %v382_v2  ;;  %v1080_v19 = vsel %vm604_vm15, 1.0, %v1323_v29  ;;  %vm126_vm1 = vcmp.eq.s32.totalorder %v1382_v20, %v1380_v18  ;;  %v965_v15 = vsel %vm125_vm0, 1.0, %v1323_v29 }
  0x49   :  { %v586_v28 = vadd.bf16 %v578_v10, %v450_v6  ;;  %v646_v30 = vpack.c.bf16 %v1080_v19, %v1079_v11  ;;  %v966_v31 = vsel %vm126_vm1, 1.0, %v1323_v29  ;;  %vm193_vm2 = vcmp.eq.s32.totalorder %v1384_v21, %v1377_v17 }
  0x4a   :  { %v169_v16 = vpack.c.bf16 %v966_v31, %v965_v15  ;;  %vm194_vm3 = vcmp.eq.s32.totalorder %v1384_v21, %v1380_v18  ;;  %v981_v32 = vsel %vm193_vm2, 1.0, %v1323_v29  ;;  %vm261_vm4 = vcmp.eq.s32.totalorder %v1386_v22, %v1377_v17 }
  0x4b   :  { %v654_v34 = vadd.bf16 %v646_v30, %v518_v14  ;;  %v982_v35 = vsel %vm194_vm3, 1.0, %v1323_v29  ;;  %vm262_vm5 = vcmp.eq.s32.totalorder %v1386_v22, %v1380_v18  ;;  %v997_v36 = vsel %vm261_vm4, 1.0, %v1323_v29 }
  0x4c   :  { %v177_v37 = vadd.bf16 0.0|0.0, %v169_v16  ;;  %v237_v38 = vpack.c.bf16 %v982_v35, %v981_v32  ;;  %v998_v39 = vsel %vm262_vm5, 1.0, %v1323_v29  ;;  %vm329_vm6 = vcmp.eq.s32.totalorder %v1388_v23, %v1377_v17 }
  0x4d   :  { %v662_v40 = vadd.bf16 %v654_v34, %v586_v28  ;;  %v305_v41 = vpack.c.bf16 %v998_v39, %v997_v36  ;;  %vm330_vm7 = vcmp.eq.s32.totalorder %v1388_v23, %v1380_v18  ;;  %v1013_v42 = vsel %vm329_vm6, 1.0, %v1323_v29 }
  0x4e   :  { %v245_v43 = vadd.bf16 0, %v237_v38  ;;  %v1014_v44 = vsel %vm330_vm7, 1.0, %v1323_v29  ;;  %vm397_vm8 = vcmp.eq.s32.totalorder %v1390_v24, %v1377_v17  ;;  %vm398_vm9 = vcmp.eq.s32.totalorder %v1390_v24, %v1380_v18 }
  0x4f   :  { %1129 = vmatprep.subr.bf16.mxu0 %v662_v40  ;;  %1159 = vmatprep.subr.bf16.mxu1 %v662_v40  ;;  %v313_v45 = vadd.bf16 %v305_v41, %v177_v37  ;;  %v373_v46 = vpack.c.bf16 %v1014_v44, %v1013_v42  ;;  %v1029_v12 = vsel %vm397_vm8, 1.0, %v1323_v29  ;;  %v1030_v13 = vsel %vm398_vm9, 1.0, %v1323_v29 }
  0x50   :  { %1130 = vmatpush3.bf16.msra.mxu0 %v662_v40  ;;  %1167 = vmatpush3.bf16.msra.mxu1 %v662_v40  ;;  %v441_v47 = vpack.c.bf16 %v1030_v13, %v1029_v12  ;;  %vm465_vm10 = vcmp.eq.s32.totalorder %v1392_v25, %v1377_v17  ;;  %vm466_vm11 = vcmp.eq.s32.totalorder %v1392_v25, %v1380_v18  ;;  %v1583_v48 = vadd.s32 32, %v1348_v1 }
  0x51   :  { %v381_v49 = vadd.bf16 %v373_v46, %v245_v43  ;;  %v1045_v50 = vsel %vm465_vm10, 1.0, %v1323_v29  ;;  %v1046_v51 = vsel %vm466_vm11, 1.0, %v1323_v29  ;;  %vm533_vm12 = vcmp.eq.s32.totalorder %v1394_v26, %v1377_v17 }
  0x52   :  { %v449_v52 = vadd.bf16 %v441_v47, %v313_v45  ;;  %v509_v53 = vpack.c.bf16 %v1046_v51, %v1045_v50  ;;  %vm534_vm13 = vcmp.eq.s32.totalorder %v1394_v26, %v1380_v18  ;;  %v1061_v54 = vsel %vm533_vm12, 1.0, %v1323_v29 }
  0x53   :  { %v1062_v55 = vsel %vm534_vm13, 1.0, %v1323_v29  ;;  %vm601_vm14 = vcmp.eq.s32.totalorder %v1396_v27, %v1377_v17  ;;  %vm602_vm15 = vcmp.eq.s32.totalorder %v1396_v27, %v1380_v18  ;;  %vm123_vm0 = vcmp.eq.s32.totalorder %v1382_v20, %v1481_v33 }
  0x54   :  { %v517_v56 = vadd.bf16 %v509_v53, %v381_v49  ;;  %v577_v57 = vpack.c.bf16 %v1062_v55, %v1061_v54  ;;  %v1077_v58 = vsel %vm601_vm14, 1.0, %v1323_v29  ;;  %v1078_v59 = vsel %vm602_vm15, 1.0, %v1323_v29 }
  0x55   :  { %v645_v60 = vpack.c.bf16 %v1078_v59, %v1077_v58  ;;  %vm124_vm1 = vcmp.eq.s32.totalorder %v1382_v20, %v1526_v61  ;;  %v963_v62 = vsel %vm123_vm0, 1.0, %v1323_v29  ;;  %vm191_vm2 = vcmp.eq.s32.totalorder %v1384_v21, %v1481_v33 }
  0x56   :  { %v585_v17 = vadd.bf16 %v577_v57, %v449_v52  ;;  %v964_v18 = vsel %vm124_vm1, 1.0, %v1323_v29  ;;  %vm192_vm3 = vcmp.eq.s32.totalorder %v1384_v21, %v1526_v61  ;;  %v979_v63 = vsel %vm191_vm2, 1.0, %v1323_v29 }
  0x57   :  { %v653_v0 = vadd.bf16 %v645_v60, %v517_v56  ;;  %v168_v2 = vpack.c.bf16 %v964_v18, %v963_v62  ;;  %v980_v3 = vsel %vm192_vm3, 1.0, %v1323_v29  ;;  %vm259_vm4 = vcmp.eq.s32.totalorder %v1386_v22, %v1481_v33 }
  0x58   :  { %v236_v4 = vpack.c.bf16 %v980_v3, %v979_v63  ;;  %vm260_vm5 = vcmp.eq.s32.totalorder %v1386_v22, %v1526_v61  ;;  %v995_v5 = vsel %vm259_vm4, 1.0, %v1323_v29  ;;  %vm327_vm6 = vcmp.eq.s32.totalorder %v1388_v23, %v1481_v33 }
  0x59   :  { %v661_v6 = vadd.bf16 %v653_v0, %v585_v17  ;;  %v176_v7 = vadd.bf16 0.0|0.0, %v168_v2  ;;  %v996_v8 = vsel %vm260_vm5, 1.0, %v1323_v29  ;;  %vm328_vm7 = vcmp.eq.s32.totalorder %v1388_v23, %v1526_v61 }
  0x5a   :  { %v244_v9 = vadd.bf16 0, %v236_v4  ;;  %v304_v10 = vpack.c.bf16 %v996_v8, %v995_v5  ;;  %v1011_v11 = vsel %vm327_vm6, 1.0, %v1323_v29  ;;  %v1012_v14 = vsel %vm328_vm7, 1.0, %v1323_v29 }
  0x5b   :  { %1131 = vmatprep.subr.bf16.mxu0 %v661_v6  ;;  %1160 = vmatprep.subr.bf16.mxu1 %v661_v6  ;;  %v372_v19 = vpack.c.bf16 %v1012_v14, %v1011_v11  ;;  %vm395_vm8 = vcmp.eq.s32.totalorder %v1390_v24, %v1481_v33  ;;  %vm396_vm9 = vcmp.eq.s32.totalorder %v1390_v24, %v1526_v61  ;;  %v1628_v15 = vadd.s32 40, %v1348_v1 }
  0x5c   :  { %1132 = vmatpush3.bf16.msra.mxu0 %v661_v6  ;;  %1168 = vmatpush3.bf16.msra.mxu1 %v661_v6  ;;  %v312_v28 = vadd.bf16 %v304_v10, %v176_v7  ;;  %v1027_v30 = vsel %vm395_vm8, 1.0, %v1323_v29  ;;  %v1028_v31 = vsel %vm396_vm9, 1.0, %v1323_v29  ;;  %vm463_vm10 = vcmp.eq.s32.totalorder %v1392_v25, %v1481_v33 }
  0x5d   :  { %v380_v16 = vadd.bf16 %v372_v19, %v244_v9  ;;  %v440_v32 = vpack.c.bf16 %v1028_v31, %v1027_v30  ;;  %vm464_vm11 = vcmp.eq.s32.totalorder %v1392_v25, %v1526_v61  ;;  %v1043_v34 = vsel %vm463_vm10, 1.0, %v1323_v29 }
  0x5e   :  { %v1044_v35 = vsel %vm464_vm11, 1.0, %v1323_v29  ;;  %vm531_vm12 = vcmp.eq.s32.totalorder %v1394_v26, %v1481_v33  ;;  %vm532_vm13 = vcmp.eq.s32.totalorder %v1394_v26, %v1526_v61  ;;  %vm599_vm14 = vcmp.eq.s32.totalorder %v1396_v27, %v1481_v33 }
  0x5f   :  { %v448_v36 = vadd.bf16 %v440_v32, %v312_v28  ;;  %v508_v37 = vpack.c.bf16 %v1044_v35, %v1043_v34  ;;  %v1059_v38 = vsel %vm531_vm12, 1.0, %v1323_v29  ;;  %v1060_v39 = vsel %vm532_vm13, 1.0, %v1323_v29 }
  0x60   :  { %v576_v40 = vpack.c.bf16 %v1060_v39, %v1059_v38  ;;  %vm600_vm15 = vcmp.eq.s32.totalorder %v1396_v27, %v1526_v61  ;;  %v1075_v41 = vsel %vm599_vm14, 1.0, %v1323_v29  ;;  %vm121_vm0 = vcmp.eq.s32.totalorder %v1382_v20, %v1583_v48 }
  0x61   :  { %v516_v42 = vadd.bf16 %v508_v37, %v380_v16  ;;  %v1076_v43 = vsel %vm600_vm15, 1.0, %v1323_v29  ;;  %vm122_vm1 = vcmp.eq.s32.totalorder %v1382_v20, %v1628_v15  ;;  %v961_v33 = vsel %vm121_vm0, 1.0, %v1323_v29 }
  0x62   :  { %v584_v44 = vadd.bf16 %v576_v40, %v448_v36  ;;  %v644_v45 = vpack.c.bf16 %v1076_v43, %v1075_v41  ;;  %v962_v46 = vsel %vm122_vm1, 1.0, %v1323_v29  ;;  %vm189_vm2 = vcmp.eq.s32.totalorder %v1384_v21, %v1583_v48 }
  0x63   :  { %v167_v61 = vpack.c.bf16 %v962_v46, %v961_v33  ;;  %vm190_vm3 = vcmp.eq.s32.totalorder %v1384_v21, %v1628_v15  ;;  %v977_v12 = vsel %vm189_vm2, 1.0, %v1323_v29  ;;  %vm257_vm4 = vcmp.eq.s32.totalorder %v1386_v22, %v1583_v48 }
  0x64   :  { %v652_v13 = vadd.bf16 %v644_v45, %v516_v42  ;;  %v978_v47 = vsel %vm190_vm3, 1.0, %v1323_v29  ;;  %vm258_vm5 = vcmp.eq.s32.totalorder %v1386_v22, %v1628_v15  ;;  %v993_v49 = vsel %vm257_vm4, 1.0, %v1323_v29 }
  0x65   :  { %v175_v50 = vadd.bf16 0.0|0.0, %v167_v61  ;;  %v235_v51 = vpack.c.bf16 %v978_v47, %v977_v12  ;;  %v994_v52 = vsel %vm258_vm5, 1.0, %v1323_v29  ;;  %vm325_vm6 = vcmp.eq.s32.totalorder %v1388_v23, %v1583_v48 }
  0x66   :  { %v660_v53 = vadd.bf16 %v652_v13, %v584_v44  ;;  %v303_v54 = vpack.c.bf16 %v994_v52, %v993_v49  ;;  %vm326_vm7 = vcmp.eq.s32.totalorder %v1388_v23, %v1628_v15  ;;  %v1009_v55 = vsel %vm325_vm6, 1.0, %v1323_v29 }
  0x67   :  { %v243_v56 = vadd.bf16 0, %v235_v51  ;;  %v1010_v57 = vsel %vm326_vm7, 1.0, %v1323_v29  ;;  %vm393_vm8 = vcmp.eq.s32.totalorder %v1390_v24, %v1583_v48  ;;  %vm394_vm9 = vcmp.eq.s32.totalorder %v1390_v24, %v1628_v15 }
  0x68   :  { %1133 = vmatprep.subr.bf16.mxu0 %v660_v53  ;;  %1161 = vmatprep.subr.bf16.mxu1 %v660_v53  ;;  %v311_v58 = vadd.bf16 %v303_v54, %v175_v50  ;;  %v371_v59 = vpack.c.bf16 %v1010_v57, %v1009_v55  ;;  %v1025_v60 = vsel %vm393_vm8, 1.0, %v1323_v29  ;;  %v1026_v62 = vsel %vm394_vm9, 1.0, %v1323_v29 }
  0x69   :  { %1134 = vmatpush3.bf16.msra.mxu0 %v660_v53  ;;  %1169 = vmatpush3.bf16.msra.mxu1 %v660_v53  ;;  %v439_v17 = vpack.c.bf16 %v1026_v62, %v1025_v60  ;;  %vm461_vm10 = vcmp.eq.s32.totalorder %v1392_v25, %v1583_v48  ;;  %vm462_vm11 = vcmp.eq.s32.totalorder %v1392_v25, %v1628_v15  ;;  %v1685_v18 = vadd.s32 16, %v1348_v1 }
  0x6a   :  { %v379_v63 = vadd.bf16 %v371_v59, %v243_v56  ;;  %v1041_v0 = vsel %vm461_vm10, 1.0, %v1323_v29  ;;  %v1042_v2 = vsel %vm462_vm11, 1.0, %v1323_v29  ;;  %vm529_vm12 = vcmp.eq.s32.totalorder %v1394_v26, %v1583_v48 }
  0x6b   :  { %v447_v3 = vadd.bf16 %v439_v17, %v311_v58  ;;  %v507_v4 = vpack.c.bf16 %v1042_v2, %v1041_v0  ;;  %vm530_vm13 = vcmp.eq.s32.totalorder %v1394_v26, %v1628_v15  ;;  %v1057_v5 = vsel %vm529_vm12, 1.0, %v1323_v29 }
  0x6c   :  { %v1058_v6 = vsel %vm530_vm13, 1.0, %v1323_v29  ;;  %vm597_vm14 = vcmp.eq.s32.totalorder %v1396_v27, %v1583_v48  ;;  %vm598_vm15 = vcmp.eq.s32.totalorder %v1396_v27, %v1628_v15  ;;  %v44_v7 = vadd.s32 24, %v1348_v1 }
  0x6d   :  { %v515_v8 = vadd.bf16 %v507_v4, %v379_v63  ;;  %v575_v9 = vpack.c.bf16 %v1058_v6, %v1057_v5  ;;  %v1073_v10 = vsel %vm597_vm14, 1.0, %v1323_v29  ;;  %v1074_v11 = vsel %vm598_vm15, 1.0, %v1323_v29 }
  0x6e   :  { %v643_v14 = vpack.c.bf16 %v1074_v11, %v1073_v10  ;;  %vm60_vm0 = vcmp.eq.s32.totalorder %v44_v7, 30  ;;  %vm119_vm1 = vcmp.eq.s32.totalorder %v1382_v20, %v1685_v18  ;;  %vm120_vm2 = vcmp.eq.s32.totalorder %v1382_v20, %v44_v7 }
  0x6f   :  { %v583_v19 = vadd.bf16 %v575_v9, %v447_v3  ;;  %v956_v48 = vsel %vm60_vm0, 1.0, %v1323_v29  ;;  %v959_v15 = vsel %vm119_vm1, 1.0, %v1323_v29  ;;  %v960_v28 = vsel %vm120_vm2, 1.0, %v1323_v29 }
  0x70   :  { %v651_v30 = vadd.bf16 %v643_v14, %v515_v8  ;;  %v106_v31 = vpack.c.bf16 %v956_v48, %v1323_v29  ;;  %v166_v16 = vpack.c.bf16 %v960_v28, %v959_v15  ;;  %vm187_vm3 = vcmp.eq.s32.totalorder %v1384_v21, %v1685_v18 }
  0x71   :  { %vm188_vm4 = vcmp.eq.s32.totalorder %v1384_v21, %v44_v7  ;;  %v975_v32 = vsel %vm187_vm3, 1.0, %v1323_v29  ;;  %vm255_vm5 = vcmp.eq.s32.totalorder %v1386_v22, %v1685_v18  ;;  %vm256_vm6 = vcmp.eq.s32.totalorder %v1386_v22, %v44_v7 }
  0x72   :  { %v659_v34 = vadd.bf16 %v651_v30, %v583_v19  ;;  %v174_v35 = vadd.bf16 %v166_v16, %v106_v31  ;;  %v976_v36 = vsel %vm188_vm4, 1.0, %v1323_v29  ;;  %v991_v37 = vsel %vm255_vm5, 1.0, %v1323_v29 }
  0x73   :  { %v234_v38 = vpack.c.bf16 %v976_v36, %v975_v32  ;;  %v992_v39 = vsel %vm256_vm6, 1.0, %v1323_v29  ;;  %vm323_vm7 = vcmp.eq.s32.totalorder %v1388_v23, %v1685_v18  ;;  %vm324_vm8 = vcmp.eq.s32.totalorder %v1388_v23, %v44_v7 }
  0x74   :  { %1135 = vmatprep.subr.bf16.mxu0 %v659_v34  ;;  %1162 = vmatprep.subr.bf16.mxu1 %v659_v34  ;;  %v302_v40 = vpack.c.bf16 %v992_v39, %v991_v37  ;;  %v1007_v41 = vsel %vm323_vm7, 1.0, %v1323_v29  ;;  %v1008_v42 = vsel %vm324_vm8, 1.0, %v1323_v29  ;;  %vm391_vm9 = vcmp.eq.s32.totalorder %v1390_v24, %v1685_v18  ;;  %v1183_v37 = vld [vmem:[#allocation5 + $0x8] sm:$0xff]   ;;  %v1185_v39 = vld [vmem:[#allocation5 + $0x10] sm:$0xff]  }
  0x75   :  { %1136 = vmatpush3.bf16.msra.mxu0 %v659_v34  ;;  %1170 = vmatpush3.bf16.msra.mxu1 %v659_v34  ;;  %v242_v43 = vadd.bf16 0, %v234_v38  ;;  %v370_v33 = vpack.c.bf16 %v1008_v42, %v1007_v41  ;;  %vm392_vm10 = vcmp.eq.s32.totalorder %v1390_v24, %v44_v7  ;;  %v1023_v44 = vsel %vm391_vm9, 1.0, %v1323_v29  ;;  %v1184_v38 = vld [vmem:[#allocation5 + $0x28] sm:$0xff]  }
  0x76   :  { %v310_v45 = vadd.bf16 %v302_v40, %v174_v35  ;;  %v1024_v46 = vsel %vm392_vm10, 1.0, %v1323_v29  ;;  %vm459_vm11 = vcmp.eq.s32.totalorder %v1392_v25, %v1685_v18  ;;  %vm460_vm12 = vcmp.eq.s32.totalorder %v1392_v25, %v44_v7  ;;  %v1186_v40 = vld [vmem:[#allocation5 + $0x30] sm:$0xff]  }
  0x77   :  { %v378_v61 = vadd.bf16 %v370_v33, %v242_v43  ;;  %v438_v12 = vpack.c.bf16 %v1024_v46, %v1023_v44  ;;  %v1039_v13 = vsel %vm459_vm11, 1.0, %v1323_v29  ;;  %v1040_v47 = vsel %vm460_vm12, 1.0, %v1323_v29 }
  0x78   :  { %v506_v49 = vpack.c.bf16 %v1040_v47, %v1039_v13  ;;  %vm527_vm13 = vcmp.eq.s32.totalorder %v1394_v26, %v1685_v18  ;;  %vm528_vm14 = vcmp.eq.s32.totalorder %v1394_v26, %v44_v7  ;;  %vm595_vm15 = vcmp.eq.s32.totalorder %v1396_v27, %v1685_v18 }
  0x79   :  { %v446_v50 = vadd.bf16 %v438_v12, %v310_v45  ;;  %v1055_v51 = vsel %vm527_vm13, 1.0, %v1323_v29  ;;  %v1056_v52 = vsel %vm528_vm14, 1.0, %v1323_v29  ;;  %vm596_vm0 = vcmp.eq.s32.totalorder %v1396_v27, %v44_v7 }
  0x7a   :  { %v514_v53 = vadd.bf16 %v506_v49, %v378_v61  ;;  %v574_v54 = vpack.c.bf16 %v1056_v52, %v1055_v51  ;;  %v1071_v55 = vsel %vm595_vm15, 1.0, %v1323_v29  ;;  %v1072_v56 = vsel %vm596_vm0, 1.0, %v1323_v29 }
  0x7b   :  { %v642_v57 = vpack.c.bf16 %v1072_v56, %v1071_v55  ;;  %v42_v58 = vadd.s32 8, %v1348_v1  ;;  %vm117_vm1 = vcmp.eq.s32.totalorder %v1382_v20, %v1348_v1  ;;  %vm185_vm2 = vcmp.eq.s32.totalorder %v1384_v21, %v1348_v1 }
  0x7c   :  { %v582_v59 = vadd.bf16 %v574_v54, %v446_v50  ;;  %v957_v60 = vsel %vm117_vm1, 1.0, %v1323_v29  ;;  %v973_v62 = vsel %vm185_vm2, 1.0, %v1323_v29  ;;  %vm253_vm3 = vcmp.eq.s32.totalorder %v1386_v22, %v1348_v1 }
  0x7d   :  { %v650_v17 = vadd.bf16 %v642_v57, %v514_v53  ;;  %vm118_vm4 = vcmp.eq.s32.totalorder %v1382_v20, %v42_v58  ;;  %vm186_vm5 = vcmp.eq.s32.totalorder %v1384_v21, %v42_v58  ;;  %vm254_vm6 = vcmp.eq.s32.totalorder %v1386_v22, %v42_v58 }
  0x7e   :  { %v958_v18 = vsel %vm118_vm4, 1.0, %v1323_v29  ;;  %v974_v63 = vsel %vm186_vm5, 1.0, %v1323_v29  ;;  %v989_v0 = vsel %vm253_vm3, 1.0, %v1323_v29  ;;  %v990_v2 = vsel %vm254_vm6, 1.0, %v1323_v29 }
  0x7f   :  { %v658_v3 = vadd.bf16 %v650_v17, %v582_v59  ;;  %v165_v4 = vpack.c.bf16 %v958_v18, %v957_v60  ;;  %v233_v5 = vpack.c.bf16 %v974_v63, %v973_v62  ;;  %v301_v6 = vpack.c.bf16 %v990_v2, %v989_v0 }
  0x80   :  { %vm321_vm7 = vcmp.eq.s32.totalorder %v1388_v23, %v1348_v1  ;;  %vm322_vm8 = vcmp.eq.s32.totalorder %v1388_v23, %v42_v58  ;;  %vm389_vm9 = vcmp.eq.s32.totalorder %v1390_v24, %v1348_v1  ;;  %vm390_vm10 = vcmp.eq.s32.totalorder %v1390_v24, %v42_v58 }
  0x81   :  { %1137 = vmatprep.subr.bf16.mxu0 %v658_v3  ;;  %1163 = vmatprep.subr.bf16.mxu1 %v658_v3  ;;  %v173_v20 = vadd.bf16 0.0|0.0, %v165_v4  ;;  %v241_v21 = vadd.bf16 0, %v233_v5  ;;  %v1005_v22 = vsel %vm321_vm7, 1.0, %v1323_v29  ;;  %v1006_v7 = vsel %vm322_vm8, 1.0, %v1323_v29 }
  0x82   :  { %1138 = vmatpush3.bf16.msra.mxu0 %v658_v3  ;;  %1171 = vmatpush3.bf16.msra.mxu1 %v658_v3  ;;  %v369_v8 = vpack.c.bf16 %v1006_v7, %v1005_v22  ;;  %v1021_v9 = vsel %vm389_vm9, 1.0, %v1323_v29  ;;  %v1022_v23 = vsel %vm390_vm10, 1.0, %v1323_v29  ;;  %vm457_vm11 = vcmp.eq.s32.totalorder %v1392_v25, %v1348_v1 }
  0x83   :  { %v309_v10 = vadd.bf16 %v301_v6, %v173_v20  ;;  %v437_v24 = vpack.c.bf16 %v1022_v23, %v1021_v9  ;;  %vm458_vm12 = vcmp.eq.s32.totalorder %v1392_v25, %v42_v58  ;;  %v1037_v11 = vsel %vm457_vm11, 1.0, %v1323_v29 }
  0x84   :  { %v377_v14 = vadd.bf16 %v369_v8, %v241_v21  ;;  %v1038_v19 = vsel %vm458_vm12, 1.0, %v1323_v29  ;;  %vm525_vm13 = vcmp.eq.s32.totalorder %v1394_v26, %v1348_v1  ;;  %vm526_vm14 = vcmp.eq.s32.totalorder %v1394_v26, %v42_v58 }
  0x85   :  { %v445_v48 = vadd.bf16 %v437_v24, %v309_v10  ;;  %v505_v15 = vpack.c.bf16 %v1038_v19, %v1037_v11  ;;  %v1053_v28 = vsel %vm525_vm13, 1.0, %v1323_v29  ;;  %v1054_v30 = vsel %vm526_vm14, 1.0, %v1323_v29 }
  0x86   :  { %v573_v31 = vpack.c.bf16 %v1054_v30, %v1053_v28  ;;  %vm593_vm15 = vcmp.eq.s32.totalorder %v1396_v27, %v1348_v1  ;;  %vm594_vm0 = vcmp.eq.s32.totalorder %v1396_v27, %v42_v58  ;;  %v1187_v1 = vld [vmem:[#allocation5 + $0x18] sm:$0xff]  }
  0x87   :  { %v513_v25 = vadd.bf16 %v505_v15, %v377_v14  ;;  %v1069_v16 = vsel %vm593_vm15, 1.0, %v1323_v29  ;;  %v1070_v32 = vsel %vm594_vm0, 1.0, %v1323_v29  ;;  %v1188_v27 = vld [vmem:[#allocation5 + $0x38] sm:$0xff]  }
  0x88   :  { %v581_v34 = vadd.bf16 %v573_v31, %v445_v48  ;;  %v641_v35 = vpack.c.bf16 %v1070_v32, %v1069_v16 }
  0x8a   :  { %v649_v26 = vadd.bf16 %v641_v35, %v513_v25 }
  0x8c   :  { %v657_v36 = vadd.bf16 %v649_v26, %v581_v34 }
  0x8e   :  { %1139 = vmatprep.subr.bf16.mxu0 %v657_v36  ;;  %1164 = vmatprep.subr.bf16.mxu1 %v657_v36 }
  0x8f   :  { %1140 = vmatpush3.bf16.msra.mxu0 %v657_v36  ;;  %1172 = vmatpush3.bf16.msra.mxu1 %v657_v36 }
  0x92   :  { %1142 = vmatmul.mubr.bf16.vlgmr.msra.gmra.mxu0 %v1183_v37  ;;  %1150 = vmatmul.mubr.bf16.vlgmr.msra.gmra.mxu1 %v1184_v38 }
  0x93   :  { %1145 = vmatprep.mubr.bf16.mxu0 %v1185_v39  ;;  %1153 = vmatprep.mubr.bf16.mxu1 %v1186_v40 }
  0x9a   :  { %1146 = vmatmul.mubr.bf16.gmra.mxu0 %v1187_v1  ;;  %1154 = vmatmul.mubr.bf16.gmra.mxu1 %v1188_v27 }
 0x152   :  { %v1143_v29 = vpop.f32.mrf.mxu0  ;;  %v1151_v41 = vpop.f32.mrf.mxu1 }
 0x153   :  { %v1095_v42 = vmul.f32 -1.442695, %v1143_v29  ;;  %v1103_v43 = vmul.f32 -1.442695, %v1151_v41 }
 0x154   :  { %v763_v33 = vpop.f32.mrf.mxu0  ;;  %v795_v44 = vpop.f32.mrf.mxu1 }
 0x155   :  { %1189 = vpow2.f32 %v1095_v42  ;;  %v1093_v45 = vmul.f32 -1.442695, %v763_v33  ;;  %v1101_v46 = vmul.f32 -1.442695, %v795_v44 }
 0x156   :  { %1191 = vpow2.f32 %v1103_v43  ;;  %v1144_v61 = vpop.f32.mrf.mxu0  ;;  %v1152_v12 = vpop.f32.mrf.mxu1 }
 0x157   :  { %1193 = vpow2.f32 %v1093_v45  ;;  %v1096_v13 = vmul.f32 -1.442695, %v1144_v61  ;;  %v1104_v47 = vmul.f32 -1.442695, %v1152_v12 }
 0x158   :  { %1195 = vpow2.f32 %v1101_v46  ;;  %v766_v49 = vpop.f32.mrf.mxu0  ;;  %v798_v50 = vpop.f32.mrf.mxu1 }
 0x159   :  { %1197 = vpow2.f32 %v1096_v13  ;;  %v1094_v51 = vmul.f32 -1.442695, %v766_v49  ;;  %v1102_v52 = vmul.f32 -1.442695, %v798_v50 }
 0x15a   :  { %1199 = vpow2.f32 %v1104_v47  ;;  %v1147_v53 = vpop.f32.mrf.mxu0  ;;  %v1155_v54 = vpop.f32.mrf.mxu1 }
 0x15b   :  { %1201 = vpow2.f32 %v1094_v51  ;;  %v1099_v55 = vmul.f32 -1.442695, %v1147_v53  ;;  %v1107_v56 = vmul.f32 -1.442695, %v1155_v54 }
 0x15c   :  { %1203 = vpow2.f32 %v1102_v52  ;;  %v779_v57 = vpop.f32.mrf.mxu0  ;;  %v811_v58 = vpop.f32.mrf.mxu1 }
 0x15d   :  { %1205 = vpow2.f32 %v1099_v55  ;;  %v1097_v59 = vmul.f32 -1.442695, %v779_v57  ;;  %v1105_v60 = vmul.f32 -1.442695, %v811_v58 }
 0x15e   :  { %1207 = vpow2.f32 %v1107_v56  ;;  %v1148_v62 = vpop.f32.mrf.mxu0  ;;  %v1156_v17 = vpop.f32.mrf.mxu1 }
 0x15f   :  { %1209 = vpow2.f32 %v1097_v59  ;;  %v1100_v18 = vmul.f32 -1.442695, %v1148_v62  ;;  %v1108_v63 = vmul.f32 -1.442695, %v1156_v17 }
 0x160   :  { %1211 = vpow2.f32 %v1105_v60  ;;  %v782_v0 = vpop.f32.mrf.mxu0  ;;  %v814_v2 = vpop.f32.mrf.mxu1 }
 0x161   :  { %1213 = vpow2.f32 %v1100_v18  ;;  %v1098_v3 = vmul.f32 -1.442695, %v782_v0  ;;  %v1106_v4 = vmul.f32 -1.442695, %v814_v2 }
 0x162   :  { %v1190_v5 = vpop.eup %1189  ;;  %1215 = vpow2.f32 %v1108_v63 }
 0x163   :  { %v1192_v6 = vpop.eup %1191  ;;  %v876_v20 = vadd.f32 1.0, %v1190_v5  ;;  %1217 = vpow2.f32 %v1098_v3 }
 0x164   :  { %v1194_v21 = vpop.eup %1193  ;;  %v884_v22 = vadd.f32 1.0, %v1192_v6  ;;  %1219 = vpow2.f32 %v1106_v4 }
 0x165   :  { %v1196_v7 = vpop.eup %1195  ;;  %1221 = vrcp.f32 %v876_v20  ;;  %v874_v8 = vadd.f32 1.0, %v1194_v21 }
 0x166   :  { %v1198_v9 = vpop.eup %1197  ;;  %1223 = vrcp.f32 %v884_v22  ;;  %v882_v23 = vadd.f32 1.0, %v1196_v7 }
 0x167   :  { %v1200_v10 = vpop.eup %1199  ;;  %1225 = vrcp.f32 %v874_v8  ;;  %v877_v24 = vadd.f32 1.0, %v1198_v9 }
 0x168   :  { %v1202_v11 = vpop.eup %1201  ;;  %1227 = vrcp.f32 %v882_v23  ;;  %v885_v14 = vadd.f32 1.0, %v1200_v10 }
 0x169   :  { %v1204_v19 = vpop.eup %1203  ;;  %1229 = vrcp.f32 %v877_v24  ;;  %v875_v48 = vadd.f32 1.0, %v1202_v11 }
 0x16a   :  { %v1206_v15 = vpop.eup %1205  ;;  %1231 = vrcp.f32 %v885_v14  ;;  %v883_v28 = vadd.f32 1.0, %v1204_v19 }
 0x16b   :  { %v1208_v30 = vpop.eup %1207  ;;  %1233 = vrcp.f32 %v875_v48  ;;  %v880_v31 = vadd.f32 1.0, %v1206_v15 }
 0x16c   :  { %v1210_v25 = vpop.eup %1209  ;;  %1235 = vrcp.f32 %v883_v28  ;;  %v888_v16 = vadd.f32 1.0, %v1208_v30 }
 0x16d   :  { %v1212_v32 = vpop.eup %1211  ;;  %1237 = vrcp.f32 %v880_v31  ;;  %v878_v34 = vadd.f32 1.0, %v1210_v25 }
 0x16e   :  { %v1214_v35 = vpop.eup %1213  ;;  %1239 = vrcp.f32 %v888_v16  ;;  %v886_v26 = vadd.f32 1.0, %v1212_v32 }
 0x16f   :  { %v1216_v36 = vpop.eup %1215  ;;  %1241 = vrcp.f32 %v878_v34  ;;  %v881_v37 = vadd.f32 1.0, %v1214_v35 }
 0x170   :  { %v1218_v38 = vpop.eup %1217  ;;  %1243 = vrcp.f32 %v886_v26  ;;  %v889_v39 = vadd.f32 1.0, %v1216_v36 }
 0x171   :  { %v1220_v40 = vpop.eup %1219  ;;  %1245 = vrcp.f32 %v881_v37  ;;  %v879_v1 = vadd.f32 1.0, %v1218_v38 }
 0x172   :  { %v1222_v27 = vpop.eup %1221  ;;  %1247 = vrcp.f32 %v889_v39  ;;  %v887_v29 = vadd.f32 1.0, %v1220_v40 }
 0x173   :  { %v1224_v41 = vpop.eup %1223  ;;  %924 = vst [vmem:[#allocation7 + $0x10] sm:$0xff] %v1222_v27  ;;  %1249 = vrcp.f32 %v879_v1 }
 0x174   :  { %v1226_v42 = vpop.eup %1225  ;;  %932 = vst [vmem:[#allocation7 + $0x50] sm:$0xff] %v1224_v41  ;;  %1251 = vrcp.f32 %v887_v29 }
 0x175   :  { %v1228_v43 = vpop.eup %1227  ;;  %922 = vst [vmem:[#allocation7] sm:$0xff] %v1226_v42 }
 0x176   :  { %v1230_v33 = vpop.eup %1229  ;;  %930 = vst [vmem:[#allocation7 + $0x40] sm:$0xff] %v1228_v43 }
 0x177   :  { %v1232_v44 = vpop.eup %1231  ;;  %925 = vst [vmem:[#allocation7 + $0x18] sm:$0xff] %v1230_v33 }
 0x178   :  { %v1234_v45 = vpop.eup %1233  ;;  %933 = vst [vmem:[#allocation7 + $0x58] sm:$0xff] %v1232_v44 }
 0x179   :  { %v1236_v46 = vpop.eup %1235  ;;  %923 = vst [vmem:[#allocation7 + $0x8] sm:$0xff] %v1234_v45 }
 0x17a   :  { %v1238_v61 = vpop.eup %1237  ;;  %931 = vst [vmem:[#allocation7 + $0x48] sm:$0xff] %v1236_v46 }
 0x17b   :  { %v1240_v12 = vpop.eup %1239  ;;  %928 = vst [vmem:[#allocation7 + $0x30] sm:$0xff] %v1238_v61 }
 0x17c   :  { %v1242_v13 = vpop.eup %1241  ;;  %936 = vst [vmem:[#allocation7 + $0x70] sm:$0xff] %v1240_v12 }
 0x17d   :  { %v1244_v47 = vpop.eup %1243  ;;  %926 = vst [vmem:[#allocation7 + $0x20] sm:$0xff] %v1242_v13 }
 0x17e   :  { %v1246_v49 = vpop.eup %1245  ;;  %934 = vst [vmem:[#allocation7 + $0x60] sm:$0xff] %v1244_v47 }
 0x17f   :  { %v1248_v50 = vpop.eup %1247  ;;  %929 = vst [vmem:[#allocation7 + $0x38] sm:$0xff] %v1246_v49 }
 0x180   :  { %v1250_v51 = vpop.eup %1249  ;;  %937 = vst [vmem:[#allocation7 + $0x78] sm:$0xff] %v1248_v50 }
 0x181   :  { %v1252_v52 = vpop.eup %1251  ;;  %927 = vst [vmem:[#allocation7 + $0x28] sm:$0xff] %v1250_v51 }
 0x182   :  { %935 = vst [vmem:[#allocation7 + $0x68] sm:$0xff] %v1252_v52 }
 0x183   :  { %1304 = shalt.err (!%p1301_p0)
}
 0x184   :  { %s1325_s22 = smov 128   ;;  %s1326_s23 = smov 8  }
 0x185   :  { %949 = dma.vmem_to_hbm [thread:$0]  %s944_s1, 2048, %s1790_s2, [#allocation4], %s1325_s22, %s1325_s22, %s1326_s23  }
 0x186   :  { %1317 = dma.done.wait [#allocation4], 2048  }
 0x187   :  { %1318 = vsyncadd [#allocation4], 4294965248 }
 0x188   :  { %953 = vsyncpa [#allocation3], 1 }
 0x189   :  { %954 = vsyncpa [#allocation6], 1 }
 0x18a   :  { %955 = vsyncpa [#allocation4], 1 }

</bundles_post_ra>
